<compile_context>
chip_gen: v7x
topology: tpu7x:2x2x1
jax: 0.10.0
libtpu: 0.0.40
codegen_flags: <defaults>
</compile_context>

<pallas_src>
import numpy as np
import jax
import jax.numpy as jnp
from jax.experimental import pallas as pl
from jax.experimental.pallas import tpu as pltpu

K_STD = 3
K_SIZE = 3 * K_STD          # 9
PAD = K_SIZE // 2           # 4
NEAR = 2.25
FAR = 3.3
MODE = "MSE"                # one of: MSE, L1, HUBER
_FILL = FAR + 1.0           # alignment-pad value; > FAR so it is masked out


def _gaussian_1d(k_size: int, std: float) -> np.ndarray:
    # scipy.signal.gaussian(k_size, std), normalized to sum 1.
    n = np.arange(k_size, dtype=np.float64) - (k_size - 1) / 2.0
    k = np.exp(-0.5 * (n / std) ** 2)
    return k / k.sum()


_K1D = _gaussian_1d(K_SIZE, K_STD)


def _round_up(x: int, m: int) -> int:
    return ((x + m - 1) // m) * m


def _blur_matrices(H: int, Ha: int, W: int, Wa: int):
    """Banded matrices implementing the 1-D gaussian blur with replicate pad.

    blur = Bh @ x @ Bw, with Bh:(Ha,Ha) acting on rows and Bw:(Wa,Wa) acting on
    columns.  Rows/cols in the alignment-pad region are zero (masked out later).
    """
    bh = np.zeros((Ha, Ha), np.float64)
    for i in range(H):
        for k in range(K_SIZE):
            j = min(max(i - PAD + k, 0), H - 1)   # replicate pad == clamp
            bh[i, j] += _K1D[k]
    bw = np.zeros((Wa, Wa), np.float64)
    for j in range(W):
        for k in range(K_SIZE):
            i = min(max(j - PAD + k, 0), W - 1)
            bw[i, j] += _K1D[k]
    return jnp.asarray(bh, jnp.float32), jnp.asarray(bw, jnp.float32)


def _depth_sim_kernel(d_ref, g_ref, bh_ref, bw_ref, sum_ref, cnt_ref):
    d = d_ref[0]              # (Ha, Wa) depth (alignment-padded with _FILL)
    g = g_ref[0]              # (Ha, Wa) depth_GT
    bh = bh_ref[...]          # (Ha, Ha) row-blur band matrix (const)
    bw = bw_ref[...]          # (Wa, Wa) col-blur band matrix (const)

    # Separable 9x9 gaussian blur with replicate padding, done on the MXU.
    blur_d = jnp.dot(jnp.dot(bh, d, preferred_element_type=jnp.float32), bw,
                     preferred_element_type=jnp.float32)
    blur_g = jnp.dot(jnp.dot(bh, g, preferred_element_type=jnp.float32), bw,
                     preferred_element_type=jnp.float32)

    # mask1 = (near < depth), forced False where depth > far  (same for GT).
    mask = ((d > NEAR) & jnp.logical_not(d > FAR)
            & (g > NEAR) & jnp.logical_not(g > FAR))
    maskf = mask.astype(jnp.float32)

    diff = blur_d - blur_g
    if MODE == "MSE":
        per = diff * diff
    elif MODE == "L1":
        per = jnp.abs(diff)
    else:  # HUBER == torch SmoothL1Loss (beta = 1.0)
        ad = jnp.abs(diff)
        per = jnp.where(ad < 1.0, 0.5 * diff * diff, ad - 0.5)

    # Lane-dense per-batch partials (sublane reduce only); the cheap cross-lane
    # + cross-batch reduction happens once, in the wrapper.
    sum_ref[0] = jnp.sum(per * maskf, axis=0, keepdims=True)
    cnt_ref[0] = jnp.sum(maskf, axis=0, keepdims=True)


def depth_similarity_loss(depth: jax.Array, depth_gt: jax.Array) -> jax.Array:
    """depth, depth_gt: (B, 1, H, W) float arrays (NCHW, as in the torch module)."""
    B, C, H, W = depth.shape
    assert C == 1, "depthSimilarityLoss expects single-channel depth maps"

    Ha = _round_up(H, 8)
    Wa = _round_up(W, 128)

    d = depth.reshape(B, H, W).astype(jnp.float32)
    g = depth_gt.reshape(B, H, W).astype(jnp.float32)
    if (Ha, Wa) != (H, W):
        pad = ((0, 0), (0, Ha - H), (0, Wa - W))
        d = jnp.pad(d, pad, mode="constant", constant_values=_FILL)
        g = jnp.pad(g, pad, mode="constant", constant_values=_FILL)

    bh, bw = _blur_matrices(H, Ha, W, Wa)

    # TODO(synk): for very large images (e.g. 1080x1920 on v7x's 64 MiB VMEM),
    # tile H into row strips with a PAD-row halo instead of whole-image blocks.

    sums, cnts = pl.pallas_call(
        _depth_sim_kernel,
        out_shape=(
            jax.ShapeDtypeStruct((B, 1, Wa), jnp.float32),
            jax.ShapeDtypeStruct((B, 1, Wa), jnp.float32),
        ),
        grid_spec=pltpu.PrefetchScalarGridSpec(
            num_scalar_prefetch=0,
            grid=(B,),
            in_specs=[
                pl.BlockSpec((1, Ha, Wa), lambda b: (b, 0, 0)),
                pl.BlockSpec((1, Ha, Wa), lambda b: (b, 0, 0)),
                pl.BlockSpec((Ha, Ha), lambda b: (0, 0)),   # constant, stays resident
                pl.BlockSpec((Wa, Wa), lambda b: (0, 0)),   # constant, stays resident
            ],
            out_specs=(
                pl.BlockSpec((1, 1, Wa), lambda b: (b, 0, 0)),
                pl.BlockSpec((1, 1, Wa), lambda b: (b, 0, 0)),
            ),
        ),
        compiler_params=pltpu.CompilerParams(
            dimension_semantics=("parallel",),
        ),
    )(d, g, bh, bw)

    # loss = (per_elem_loss * mask).sum() / mask.sum()   (no zero-guard: matches torch)
    return jnp.sum(sums) / jnp.sum(cnts)


if __name__ == "__main__":
    key = jax.random.PRNGKey(0)
    k1, k2 = jax.random.split(key)
    B, C, H, W = 2, 1, 16, 16
    # Depth values spanning [2.0, 3.6] so the (near, far] mask has both True and False.
    depth = jax.random.uniform(k1, (B, C, H, W), jnp.float32, minval=2.0, maxval=3.6)
    depth_gt = depth + 0.05 * jax.random.normal(k2, (B, C, H, W), jnp.float32)

    loss = depth_similarity_loss(depth, depth_gt)
    jax.block_until_ready(loss)
    assert jnp.isfinite(loss)
    print("KERNEL_OK")
</pallas_src>

<mosaic_0001>
module attributes {stable_mosaic.version = 11 : i64} {
  func.func @_depth_sim_kernel(%arg0: i32, %arg1: memref<1x16x128xf32, #tpu.memory_space<vmem>>, %arg2: memref<1x16x128xf32, #tpu.memory_space<vmem>>, %arg3: memref<16x16xf32, #tpu.memory_space<vmem>>, %arg4: memref<128x128xf32, #tpu.memory_space<vmem>>, %arg5: memref<1x1x128xf32, #tpu.memory_space<vmem>>, %arg6: memref<1x1x128xf32, #tpu.memory_space<vmem>>) attributes {dimension_semantics = [#tpu.dimension_semantics<parallel>], iteration_bounds = array<i64: 2>, scalar_prefetch = 0 : i64, scratch_operands = 0 : i64, tpu.core_type = #tpu.core_type<tc>, window_params = [{transform_indices = @transform_0, window_bounds = array<i64: 1, 16, 128>}, {transform_indices = @transform_1, window_bounds = array<i64: 1, 16, 128>}, {pipeline_mode = #tpu.pipeline_mode<synchronous>, transform_indices = @transform_2, window_bounds = array<i64: 16, 16>}, {pipeline_mode = #tpu.pipeline_mode<synchronous>, transform_indices = @transform_3, window_bounds = array<i64: 128, 128>}, {transform_indices = @transform_4, window_bounds = array<i64: 1, 1, 128>}, {transform_indices = @transform_5, window_bounds = array<i64: 1, 1, 128>}]} {
    %c0 = arith.constant 0 : index
    %c0_0 = arith.constant 0 : index
    %c0_1 = arith.constant 0 : index
    %0 = vector.load %arg1[%c0, %c0_0, %c0_1] : memref<1x16x128xf32, #tpu.memory_space<vmem>>, vector<1x16x128xf32>
    %1 = vector.shape_cast %0 : vector<1x16x128xf32> to vector<16x128xf32>
    %c0_2 = arith.constant 0 : index
    %c0_3 = arith.constant 0 : index
    %c0_4 = arith.constant 0 : index
    %2 = vector.load %arg2[%c0_2, %c0_3, %c0_4] : memref<1x16x128xf32, #tpu.memory_space<vmem>>, vector<1x16x128xf32>
    %3 = vector.shape_cast %2 : vector<1x16x128xf32> to vector<16x128xf32>
    %c0_5 = arith.constant 0 : index
    %c0_6 = arith.constant 0 : index
    %4 = vector.load %arg3[%c0_5, %c0_6] : memref<16x16xf32, #tpu.memory_space<vmem>>, vector<16x16xf32>
    %c0_7 = arith.constant 0 : index
    %c0_8 = arith.constant 0 : index
    %5 = vector.load %arg4[%c0_7, %c0_8] : memref<128x128xf32, #tpu.memory_space<vmem>>, vector<128x128xf32>
    %cst = arith.constant dense<0.000000e+00> : vector<16x128xf32>
    %6 = tpu.matmul %4, %1, %cst {dimension_numbers = #tpu.dot_dimension_numbers<[1], [0], [0], [1], [0, 0, 1, 1], [], []>} : vector<16x16xf32>, vector<16x128xf32>, vector<16x128xf32> -> vector<16x128xf32>
    %cst_9 = arith.constant dense<0.000000e+00> : vector<16x128xf32>
    %7 = tpu.matmul %6, %5, %cst_9 {dimension_numbers = #tpu.dot_dimension_numbers<[1], [0], [0], [1], [0, 0, 1, 1], [], []>} : vector<16x128xf32>, vector<128x128xf32>, vector<16x128xf32> -> vector<16x128xf32>
    %cst_10 = arith.constant dense<0.000000e+00> : vector<16x128xf32>
    %8 = tpu.matmul %4, %3, %cst_10 {dimension_numbers = #tpu.dot_dimension_numbers<[1], [0], [0], [1], [0, 0, 1, 1], [], []>} : vector<16x16xf32>, vector<16x128xf32>, vector<16x128xf32> -> vector<16x128xf32>
    %cst_11 = arith.constant dense<0.000000e+00> : vector<16x128xf32>
    %9 = tpu.matmul %8, %5, %cst_11 {dimension_numbers = #tpu.dot_dimension_numbers<[1], [0], [0], [1], [0, 0, 1, 1], [], []>} : vector<16x128xf32>, vector<128x128xf32>, vector<16x128xf32> -> vector<16x128xf32>
    %cst_12 = arith.constant 2.250000e+00 : f32
    %10 = vector.broadcast %cst_12 : f32 to vector<16x128xf32>
    %11 = arith.cmpf ogt, %1, %10 : vector<16x128xf32>
    %cst_13 = arith.constant 3.300000e+00 : f32
    %12 = vector.broadcast %cst_13 : f32 to vector<16x128xf32>
    %13 = arith.cmpf ogt, %1, %12 : vector<16x128xf32>
    %cst_14 = arith.constant dense<true> : vector<16x128xi1>
    %14 = arith.xori %13, %cst_14 : vector<16x128xi1>
    %15 = arith.andi %11, %14 : vector<16x128xi1>
    %cst_15 = arith.constant 2.250000e+00 : f32
    %16 = vector.broadcast %cst_15 : f32 to vector<16x128xf32>
    %17 = arith.cmpf ogt, %3, %16 : vector<16x128xf32>
    %18 = arith.andi %15, %17 : vector<16x128xi1>
    %cst_16 = arith.constant 3.300000e+00 : f32
    %19 = vector.broadcast %cst_16 : f32 to vector<16x128xf32>
    %20 = arith.cmpf ogt, %3, %19 : vector<16x128xf32>
    %cst_17 = arith.constant dense<true> : vector<16x128xi1>
    %21 = arith.xori %20, %cst_17 : vector<16x128xi1>
    %22 = arith.andi %18, %21 : vector<16x128xi1>
    %23 = arith.extui %22 : vector<16x128xi1> to vector<16x128xi32>
    %24 = arith.sitofp %23 : vector<16x128xi32> to vector<16x128xf32>
    %25 = arith.subf %7, %9 : vector<16x128xf32>
    %26 = arith.mulf %25, %25 : vector<16x128xf32>
    %27 = arith.mulf %26, %24 : vector<16x128xf32>
    %cst_18 = arith.constant dense<0.000000e+00> : vector<128xf32>
    %28 = vector.multi_reduction <add>, %27, %cst_18 [0] : vector<16x128xf32> to vector<128xf32>
    %29 = vector.shape_cast %28 : vector<128xf32> to vector<1x128xf32>
    %c0_19 = arith.constant 0 : index
    %c0_20 = arith.constant 0 : index
    %c0_21 = arith.constant 0 : index
    %30 = vector.load %arg5[%c0_19, %c0_20, %c0_21] : memref<1x1x128xf32, #tpu.memory_space<vmem>>, vector<1x1x128xf32>
    %31 = vector.shape_cast %30 : vector<1x1x128xf32> to vector<1x128xf32>
    %32 = vector.shape_cast %29 : vector<1x128xf32> to vector<1x1x128xf32>
    tpu.vector_store %arg5[%c0_19, %c0_20, %c0_21], %32 {strides = array<i32>} : memref<1x1x128xf32, #tpu.memory_space<vmem>>, vector<1x1x128xf32>,
    %cst_22 = arith.constant dense<0.000000e+00> : vector<128xf32>
    %33 = vector.multi_reduction <add>, %24, %cst_22 [0] : vector<16x128xf32> to vector<128xf32>
    %34 = vector.shape_cast %33 : vector<128xf32> to vector<1x128xf32>
    %c0_23 = arith.constant 0 : index
    %c0_24 = arith.constant 0 : index
    %c0_25 = arith.constant 0 : index
    %35 = vector.load %arg6[%c0_23, %c0_24, %c0_25] : memref<1x1x128xf32, #tpu.memory_space<vmem>>, vector<1x1x128xf32>
    %36 = vector.shape_cast %35 : vector<1x1x128xf32> to vector<1x128xf32>
    %37 = vector.shape_cast %34 : vector<1x128xf32> to vector<1x1x128xf32>
    tpu.vector_store %arg6[%c0_23, %c0_24, %c0_25], %37 {strides = array<i32>} : memref<1x1x128xf32, #tpu.memory_space<vmem>>, vector<1x1x128xf32>,
    return
  }
  func.func @transform_0(%arg0: i32) -> (i32, i32, i32) {
    %c0_i32 = arith.constant 0 : i32
    %c0_i32_0 = arith.constant 0 : i32
    %c0_i32_1 = arith.constant 0 : i32
    return %arg0, %c0_i32, %c0_i32_0 : i32, i32, i32
  }
  func.func @transform_1(%arg0: i32) -> (i32, i32, i32) {
    %c0_i32 = arith.constant 0 : i32
    %c0_i32_0 = arith.constant 0 : i32
    %c0_i32_1 = arith.constant 0 : i32
    return %arg0, %c0_i32, %c0_i32_0 : i32, i32, i32
  }
  func.func @transform_2(%arg0: i32) -> (i32, i32) {
    %c0_i32 = arith.constant 0 : i32
    %c0_i32_0 = arith.constant 0 : i32
    %c0_i32_1 = arith.constant 0 : i32
    return %c0_i32, %c0_i32_0 : i32, i32
  }
  func.func @transform_3(%arg0: i32) -> (i32, i32) {
    %c0_i32 = arith.constant 0 : i32
    %c0_i32_0 = arith.constant 0 : i32
    %c0_i32_1 = arith.constant 0 : i32
    return %c0_i32, %c0_i32_0 : i32, i32
  }
  func.func @transform_4(%arg0: i32) -> (i32, i32, i32) {
    %c0_i32 = arith.constant 0 : i32
    %c0_i32_0 = arith.constant 0 : i32
    %c0_i32_1 = arith.constant 0 : i32
    return %arg0, %c0_i32, %c0_i32_0 : i32, i32, i32
  }
  func.func @transform_5(%arg0: i32) -> (i32, i32, i32) {
    %c0_i32 = arith.constant 0 : i32
    %c0_i32_0 = arith.constant 0 : i32
    %c0_i32_1 = arith.constant 0 : i32
    return %arg0, %c0_i32, %c0_i32_0 : i32, i32, i32
  }
}

</mosaic_0001>

<bundles_post_ra>
// kernel: tpu_custom_call.1
= control target key start
LH: loop header
LB: loop body
LE: loop exit
PB: predicated region body
PF: predicated region fallthrough
CT: control target
= control target key end

     0   :  { %s1780_s0 = inlined_call_operand.hbm [shape: f32[2,16,128], index: 0, kind: input, shape index: {}]   ;;  %s1781_s1 = inlined_call_operand.hbm [shape: f32[2,16,128], index: 1, kind: input, shape index: {}]   ;;  %s1782_s2 = inlined_call_operand.hbm [shape: f32[16,16], index: 2, kind: input, shape index: {}]   ;;  %s1783_s3 = inlined_call_operand.hbm [shape: f32[128,128], index: 3, kind: input, shape index: {}]   ;;  %s1784_s4 = inlined_call_operand.hbm [shape: f32[2,1,128], index: 4, kind: output, shape index: {0}]   ;;  %s1785_s5 = inlined_call_operand.hbm [shape: f32[2,1,128], index: 5, kind: output, shape index: {1}]  }
   0x1   :  { %1793 = sst [smem:[#allocation19_spill]] %s1780_s0 }
   0x2   :  { %1794 = sst [smem:[#allocation20_spill]] %s1782_s2 }
   0x3   :  { %11 = vsyncpa [#allocation3], 0 }
   0x4   :  { %13 = vsyncpa [#allocation3 + $0x1], 0 }
   0x5   :  { %14 = vsyncpa [#allocation6], 0 }
   0x6   :  { %16 = vsyncpa [#allocation6 + $0x1], 0 }
   0x7   :  { %17 = vsyncpa [#allocation9], 0 }
   0x8   :  { %18 = vsyncpa [#allocation4], 0 }
   0x9   :  { %20 = vsyncpa [#allocation4 + $0x1], 0 }
   0xa   :  { %21 = vsyncpa [#allocation12], 0 }
   0xb   :  { %23 = vsyncpa [#allocation12 + $0x1], 0  ;;  %s1437_s18 = smov 0   ;;  %s1439_s19 = smov 0  }
   0xc   :  { %s1441_s20 = smov 0   ;;  %s1443_s21 = smov 0  }
   0xd LB: > { %s1458_s22 = sadd.s32 4294967295, %s1395_s21   ;;  %s860_s23 = sadd.s32 4294967294, %s1395_s21   ;;  %s1395_s21 = sphi %s1443_s21, %s1817_s21   ;;  %s1391_s20 = sphi %s1441_s20, %s1816_s20   ;;  %s1387_s19 = sphi %s1439_s19, %s1815_s19   ;;  %s1383_s18 = sphi %s1437_s18, %s1814_s18  }
   0xe   : > { %p49_p0 = scmp.ne.s32.totalorder %s1387_s19, %s1383_s18  ;;  %p1786_p1 = scmp.eq.s32.totalorder %s1458_s22, 0 }
   0xf   : > { %p147_p3 = scmp.eq.s32.totalorder %s860_s23, 1  ;;  %p861_p5 = scmp.ge.s32.totalorder %s1395_s21, 1 }
  0x10   : > { %p1467_p4 = por %p1786_p1, %p49_p0  ;;  %p180_p7 = scmp.lt.s32.totalorder %s1395_s21, 3 }
  0x11   : > { %p1472_p6 = por %p147_p3, %p49_p0  ;;  %s1397_s27 = smov [#allocation7]  }
  0x12   : > { %s1795_s24 = scalar_select %p1467_p4, 1, 0 }
  0x13   : > { %s1796_s25 = scalar_select %p1472_p6, 1, 0 }
  0x14   : > { %p1477_p8 = pnand %p861_p5, %p180_p7  ;;  %s192_s28 = sshll.u32 %s1397_s27, 4  ;;  %s1481_s28 = int_to_ptr.vmem [resolvable:$true] %s192_s28 }
  0x15   : > { %s1398_s30 = smov [#allocation8]   ;;  %s1799_s2 = sld [smem:[#allocation20_spill]] }
  0x16   : > { %p1104_p9 = pneg %p1477_p8  ;;  %s205_s6 = sshll.u32 %s1398_s30, 4  ;;  %s1492_s6 = int_to_ptr.vmem [resolvable:$true] %s205_s6 }
  0x18   : > { %p1488_p11 = pnand %p1104_p9, %p1786_p1 }
  0x1a   : > { %p1171_p13 = pneg %p1488_p11 }
  0x1b   : > { %s1169_s9 = scalar_lea.hbm %s1799_s2, 256 }
  0x1c   : > { %p1170_p12 = scmp.ne.s32.totalorder %s1799_s2, %s1169_s9  ;;  %p1176_p5 = scmp.lt.u32.totalorder %s1169_s9, %s1799_s2 }
  0x1e   : > { %p1172_p0 = pnand %p1171_p13, %p1170_p12 }
  0x20   : > { %p1173_p3 = pneg %p1172_p0 }
  0x22   : > { %p1178_p7 = pnand %p1176_p5, %p1173_p3 }
  0x24   : > { %1181 = shalt.err (!%p1178_p7)
}
  0x25   : > { %s1182_s14 = scalar_lea.vmem %s1481_s28, 256  ;;  %p1190_p2 = scmp.lt.s32.totalorder %s1481_s28, %s1481_s28 }
  0x26   : > { %p1183_p9 = scmp.ne.s32.totalorder %s1481_s28, %s1182_s14  ;;  %p1191_p12 = scmp.lt.s32.totalorder %s1182_s14, %s1182_s14 }
  0x28   : > { %p1185_p10 = pnand %p1183_p9, %p1171_p13  ;;  %p1192_p0 = por %p1191_p12, %p1190_p2 }
  0x2a   : > { %p1186_p1 = pneg %p1185_p10 }
  0x2c   : > { %p1193_p6 = pnand %p1192_p0, %p1186_p1 }
  0x2e   : > { %1196 = shalt.err (!%p1193_p6)
}
  0x2f   : > { %s1787_s15 = smov 128   ;;  %s1789_s16 = smov 8  }
  0x30   : > { %1107 = dma.hbm_to_vmem [thread:$0]  (!%p1488_p11), %s1799_s2, 256, %s1481_s28, [#allocation6], %s1787_s15, %s1787_s15, %s1789_s16  }
  0x31   : > { %s1197_s7 = scalar_lea.hbm %s1783_s3, 2048 }
  0x32   : > { %p1198_p1 = scmp.ne.s32.totalorder %s1783_s3, %s1197_s7  ;;  %p1204_p10 = scmp.lt.u32.totalorder %s1197_s7, %s1783_s3 }
  0x34   : > { %p1200_p2 = pnand %p1198_p1, %p1171_p13 }
  0x36   : > { %p1201_p6 = pneg %p1200_p2 }
  0x38   : > { %p1206_p3 = pnand %p1204_p10, %p1201_p6 }
  0x3a   : > { %1209 = shalt.err (!%p1206_p3)
}
  0x3b   : > { %s1210_s28 = scalar_lea.vmem %s1492_s6, 2048  ;;  %p1218_p12 = scmp.lt.s32.totalorder %s1492_s6, %s1492_s6 }
  0x3c   : > { %p1211_p5 = scmp.ne.s32.totalorder %s1492_s6, %s1210_s28  ;;  %p1219_p0 = scmp.lt.s32.totalorder %s1210_s28, %s1210_s28 }
  0x3e   : > { %p1213_p7 = pnand %p1211_p5, %p1171_p13  ;;  %p1220_p1 = por %p1219_p0, %p1218_p12 }
  0x40   : > { %p1214_p9 = pneg %p1213_p7 }
  0x42   : > { %p1221_p2 = pnand %p1220_p1, %p1214_p9 }
  0x44   : > { %1224 = shalt.err (!%p1221_p2)
}
  0x45   : > { %1110 = dma.hbm_to_vmem [thread:$0]  (!%p1488_p11), %s1783_s3, 2048, %s1492_s6, [#allocation9], %s1787_s15, %s1787_s15, %s1789_s16  }
  0x46   : > { %s1553_s29 = sadd.s32 1, %s1395_s21   ;;  %s36_s14 = sadd.s32 1, %s1391_s20 }
  0x47   : > { %s33_s17 = ssub.s32 %s1395_s21, %s1553_s29  ;;  %p43_p13 = scmp.ne.s32.totalorder %s1391_s20, %s1387_s19 }
  0x48   : > { %p34_p6 = scmp.eq.s32.totalorder %s33_s17, 0  ;;  %p44_p10 = scmp.eq.s32.totalorder %s1395_s21, 0 }
  0x49   : > { %p1800_p3 = scmp.eq.s32.totalorder %s1458_s22, 1  ;;  %p1127_p7 = scmp.lt.s32.totalorder %s1395_s21, 2 }
  0x4a   : > { %s1569_s27 = scalar_select %p34_p6, %s1391_s20, %s36_s14  }
  0x4b   : > { %p1563_p5 = por %p1800_p3, %p43_p13  ;;  %p45_p9 = por %p44_p10, %p43_p13 }
  0x4c   : > { %s219_s30 = sand.u32 1, %s1391_s20   ;;  %s886_s6 = sshll.u32 %s1395_s21, 8 }
  0x4d   : > { %s1801_s23 = scalar_select %p1563_p5, 1, 0 }
  0x4e   : > { %s865_s7 = sshll.u32 %s219_s30, 4  ;;  %s1802_s0 = sld [smem:[#allocation19_spill]] }
  0x4f   : > { %s223_s11 = scalar_lea.vmem [#allocation2], %s865_s7  ;;  %p1580_p11 = pnand %p1127_p7, %p45_p9 }
  0x50   : > { %s230_s28 = sshll.u32 %s223_s11, 4  ;;  %s1587_s17 = scalar_lea.hbm %s1781_s1, %s886_s6  ;;  %s1578_s28 = int_to_ptr.vmem [resolvable:$true] %s230_s28 }
  0x51   : > { %s244_s8 = scalar_lea.vmem [#allocation5], %s865_s7  ;;  %s1591_s15 = scalar_lea.sflag [#allocation3], %s219_s30 }
  0x52   : > { %s1589_s9 = sshll.u32 %s244_s8, 4  ;;  %p1227_p0 = pneg %p1580_p11  ;;  %s1623_s9 = int_to_ptr.vmem [resolvable:$true] %s1589_s9 }
  0x54   : > { %s1576_s10 = scalar_lea.hbm %s1802_s0, %s886_s6  ;;  %s1230_s13 = scalar_lea.hbm %s1802_s0, 512 }
  0x55   : > { %s1225_s11 = scalar_lea.hbm %s1576_s10, 256  ;;  %p1231_p13 = scmp.lt.u32.totalorder %s1576_s10, %s1802_s0 }
  0x56   : > { %p1226_p12 = scmp.ne.s32.totalorder %s1576_s10, %s1225_s11  ;;  %p1232_p6 = scmp.lt.u32.totalorder %s1230_s13, %s1225_s11 }
  0x57   : > { %p1234_p3 = scmp.lt.u32.totalorder %s1225_s11, %s1576_s10 }
  0x58   : > { %p1228_p1 = pnand %p1227_p0, %p1226_p12  ;;  %p1233_p10 = por %p1232_p6, %p1231_p13 }
  0x5a   : > { %p1229_p2 = pneg %p1228_p1  ;;  %p1235_p7 = por %p1234_p3, %p1233_p10 }
  0x5c   : > { %p1236_p9 = pnand %p1235_p7, %p1229_p2 }
  0x5e   : > { %1239 = shalt.err (!%p1236_p9)
}
  0x5f   : > { %s1240_s30 = scalar_lea.vmem %s1578_s28, 256  ;;  %s1401_s2 = smov [#allocation2]  }
  0x60   : > { %p1241_p12 = scmp.ne.s32.totalorder %s1578_s28, %s1240_s30  ;;  %s1245_s16 = sshll.u32 %s1401_s2, 4  ;;  %s1246_s16 = int_to_ptr.vmem [resolvable:$false] %s1245_s16 }
  0x61   : > { %s1247_s7 = scalar_lea.vmem %s1246_s16, 512  ;;  %p1248_p4 = scmp.lt.s32.totalorder %s1578_s28, %s1246_s16 }
  0x62   : > { %p1243_p1 = pnand %p1241_p12, %p1227_p0  ;;  %p1249_p13 = scmp.lt.s32.totalorder %s1247_s7, %s1240_s30 }
  0x64   : > { %p1244_p5 = pneg %p1243_p1  ;;  %p1250_p6 = por %p1249_p13, %p1248_p4 }
  0x66   : > { %p1251_p10 = pnand %p1250_p6, %p1244_p5 }
  0x68   : > { %1254 = shalt.err (!%p1251_p10)
}
  0x69   : > { %s1804_s8 = smov 8   ;;  %s1805_s11 = smov 128  }
  0x6a   : > { %1114 = dma.hbm_to_vmem [thread:$0]  (!%p1580_p11), %s1576_s10, 256, %s1578_s28, %s1591_s15, %s1805_s11, %s1805_s11, %s1804_s8  }
  0x6b   : > { %s240_s13 = sand.u32 1, %s1395_s21   ;;  %s1255_s6 = scalar_lea.hbm %s1587_s17, 256 }
  0x6c   : > { %s1626_s14 = scalar_lea.sflag [#allocation6], %s240_s13  ;;  %p1256_p4 = scmp.ne.s32.totalorder %s1587_s17, %s1255_s6 }
  0x6d   : > { %s1260_s16 = scalar_lea.hbm %s1781_s1, 512  ;;  %p1261_p3 = scmp.lt.u32.totalorder %s1587_s17, %s1781_s1 }
  0x6e   : > { %p1258_p5 = pnand %p1256_p4, %p1227_p0  ;;  %p1262_p7 = scmp.lt.u32.totalorder %s1260_s16, %s1255_s6 }
  0x6f   : > { %p1264_p12 = scmp.lt.u32.totalorder %s1255_s6, %s1587_s17 }
  0x70   : > { %p1259_p2 = pneg %p1258_p5  ;;  %p1263_p9 = por %p1262_p7, %p1261_p3 }
  0x72   : > { %p1265_p1 = por %p1264_p12, %p1263_p9 }
  0x74   : > { %p1266_p13 = pnand %p1265_p1, %p1259_p2 }
  0x76   : > { %1269 = shalt.err (!%p1266_p13)
}
  0x77   : > { %s1270_s15 = scalar_lea.vmem %s1623_s9, 256  ;;  %s1402_s10 = smov [#allocation5]  }
  0x78   : > { %p1271_p6 = scmp.ne.s32.totalorder %s1623_s9, %s1270_s15  ;;  %s1275_s28 = sshll.u32 %s1402_s10, 4  ;;  %s1276_s28 = int_to_ptr.vmem [resolvable:$false] %s1275_s28 }
  0x79   : > { %s1277_s0 = scalar_lea.vmem %s1276_s28, 512  ;;  %p1278_p5 = scmp.lt.s32.totalorder %s1623_s9, %s1276_s28 }
  0x7a   : > { %p1273_p10 = pnand %p1271_p6, %p1227_p0  ;;  %p1279_p3 = scmp.lt.s32.totalorder %s1277_s0, %s1270_s15 }
  0x7c   : > { %p1274_p4 = pneg %p1273_p10  ;;  %p1280_p7 = por %p1279_p3, %p1278_p5 }
  0x7e   : > { %p1281_p9 = pnand %p1280_p7, %p1274_p4 }
  0x80   : > { %1284 = shalt.err (!%p1281_p9)
}
  0x81   : > { %1117 = dma.hbm_to_vmem [thread:$0]  (!%p1580_p11), %s1587_s17, 256, %s1623_s9, %s1626_s14, %s1805_s11, %s1805_s11, %s1804_s8  }
  0x82   : > { %263 = sbr.rel (%p1477_p8) target bundleno = 616 (0x268), region = 36  ;;  %s1658_s13 = sand.u32 (!%p1477_p8), 1, %s1387_s19  }
  0x83   : > { %s872_s6 = sshll.u32 (!%p1477_p8), %s1658_s13, 4  ;;  %s266_s30 = scalar_lea.sflag (!%p1477_p8), [#allocation3], %s1658_s13 }
  0x84   : > { %s269_s2 = scalar_lea.vmem (!%p1477_p8), [#allocation2], %s872_s6  ;;  %p1806_p0 = scmp.ne.s32.totalorder (!%p1477_p8), %s1795_s24, 0 }
  0x89   : > { %1358 = dma.done.wait (%p1806_p0), %s266_s30, 256  }
  0x8a   : > { %1360 = vsyncadd (%p1806_p0), %s266_s30, 4294967040  ;;  %s274_s12 = sand.u32 1, %s1458_s22   ;;  %s278_s26 = scalar_lea.vmem [#allocation5], %s872_s6 }
  0x8b   : > { %s275_s17 = scalar_lea.sflag [#allocation6], %s274_s12 }
  0x8c   : > { %1362 = dma.done.wait (%p1806_p0), %s275_s17, 256  }
  0x8d   : > { %1364 = vsyncadd (%p1806_p0), %s275_s17, 4294967040  ;;  %p1807_p8 = scmp.eq.s32.totalorder %s1458_s22, 0 }
  0x8f   : > { %1366 = dma.done.wait (%p1807_p8), [#allocation6], 256   ;;  %p1808_p11 = pmov %p1807_p8 }
  0x90   : > { %p1809_p2 = pmov %p1807_p8 }
  0x91   : > { %1368 = vsyncadd (%p1808_p11), [#allocation6], 4294967040 }
  0x92   : > { %1370 = dma.done.wait (%p1809_p2), [#allocation9], 2048   ;;  %p1810_p12 = pmov %p1809_p2 }
  0x93   : > { %vm343_vm0 = vcmask 130048   ;;  %v1679_v0 = vld [vmem:[%s269_s2] sm:$0xff]  ;;  %v1681_v1 = vld [vmem:[%s269_s2 + $0x8] sm:$0xff]  ;;  %vm1403_vm4 = vmmov 1   ;;  %v1404_v36 = vmov 0.0   ;;  %s882_s24 = sshll.u32 %s1458_s22, 4 }
  0x94   : > { %1372 = vsyncadd (%p1810_p12), [#allocation9], 4294965248  ;;  %v1683_v2 = vld [vmem:[%s278_s26] sm:$0xff]  ;;  %v1016_v3 = vpack.c.bf16 %v1681_v1, %v1679_v0  ;;  %v1687_v4 = vld [vmem:[%s278_s26 + $0x8] sm:$0xff]  ;;  %vm653_vm1 = vcmp.gt.f32.partialorder %v1681_v1, 3.3  ;;  %s1710_s14 = scalar_lea.hbm %s1785_s5, %s882_s24 }
  0x95   : > { %v325_v5 = vld [vmem:[#allocation7] sm:$0xff]  ;;  %v1052_v6 = vpack.c.bf16 %v1687_v4, %v1683_v2  ;;  %v327_v7 = vld [vmem:[#allocation8] sm:$0xff]  ;;  %v328_v8 = vld [vmem:[#allocation8 + $0x8] sm:$0xff]  ;;  %vm652_vm2 = vcmp.gt.f32.partialorder %v1679_v0, 3.3  ;;  %vm651_vm3 = vcmp.gt.f32.partialorder %v1681_v1, 2.25 }
  0x96   : > { %936 = vmatprep.mubr.msk.f32.mxu1 %vm343_vm0, %v325_v5  ;;  %978 = vmatprep.mubr.msk.f32.mxu0 %vm343_vm0, %v325_v5  ;;  %v329_v9 = vld [vmem:[#allocation8 + $0x10] sm:$0xff]  ;;  %v326_v10 = vld [vmem:[#allocation7 + $0x8] sm:$0xff]  ;;  %v1020_v11 = vpack.c.bf16 %v328_v8, %v327_v7  ;;  %v331_v14 = vld [vmem:[#allocation8 + $0x20] sm:$0xff]  ;;  %vm659_vm6 = vcmp.gt.f32.partialorder %v1687_v4, 2.25  ;;  %vm663_vm8 = vcmp.gt.f32.partialorder %v1687_v4, 3.3 }
  0x97   : > { %1017 = vmatprep.subr.bf16.mxu1 %v1016_v3  ;;  %1053 = vmatprep.subr.bf16.mxu0 %v1052_v6  ;;  %v330_v12 = vld [vmem:[#allocation8 + $0x18] sm:$0xff]  ;;  %v332_v15 = vld [vmem:[#allocation8 + $0x28] sm:$0xff]  ;;  %v333_v17 = vld [vmem:[#allocation8 + $0x30] sm:$0xff]  ;;  %vm650_vm10 = vcmp.gt.f32.partialorder %v1679_v0, 2.25  ;;  %vm658_vm12 = vcmp.gt.f32.partialorder %v1683_v2, 2.25  ;;  %s320_s9 = scalar_lea.vmem [#allocation11], %s1658_s13 }
  0x98   : > { %1019 = vmatpush3.bf16.msra.mxu1 %v1016_v3  ;;  %1055 = vmatpush3.bf16.msra.mxu0 %v1052_v6  ;;  %v1024_v13 = vpack.c.bf16 %v330_v12, %v329_v9  ;;  %v1028_v16 = vpack.c.bf16 %v332_v15, %v331_v14  ;;  %v334_v18 = vld [vmem:[#allocation8 + $0x38] sm:$0xff]  ;;  %v335_v20 = vld [vmem:[#allocation8 + $0x40] sm:$0xff]  ;;  %v336_v21 = vld [vmem:[#allocation8 + $0x48] sm:$0xff]  ;;  %vm662_vm14 = vcmp.gt.f32.partialorder %v1683_v2, 3.3  ;;  %s724_s16 = sshll.u32 %s320_s9, 4  ;;  %s725_s16 = int_to_ptr.vmem [resolvable:$true] %s724_s16 }
  0x99   : > { %1021 = vmatprep.subr.bf16.mxu1 %v1020_v11  ;;  %1057 = vmatprep.subr.bf16.mxu0 %v1020_v11  ;;  %v1032_v19 = vpack.c.bf16 %v334_v18, %v333_v17  ;;  %v1036_v22 = vpack.c.bf16 %v336_v21, %v335_v20  ;;  %v337_v23 = vld [vmem:[#allocation8 + $0x50] sm:$0xff]  ;;  %v338_v24 = vld [vmem:[#allocation8 + $0x58] sm:$0xff]  ;;  %v339_v26 = vld [vmem:[#allocation8 + $0x60] sm:$0xff]  ;;  %s699_s7 = scalar_lea.sflag [#allocation12], %s1658_s13  ;;  %s1285_s15 = scalar_lea.vmem %s725_s16, 16 }
  0x9a   : > { %v1040_v25 = vpack.c.bf16 %v338_v24, %v337_v23  ;;  %v340_v27 = vld [vmem:[#allocation8 + $0x68] sm:$0xff]  ;;  %v341_v29 = vld [vmem:[#allocation8 + $0x70] sm:$0xff]  ;;  %v342_v30 = vld [vmem:[#allocation8 + $0x78] sm:$0xff]  ;;  %p1286_p1 = scmp.ne.s32.totalorder %s725_s16, %s1285_s15  ;;  %p1811_p13 = scmp.ne.s32.totalorder %s1801_s23, 0 }
  0x9b   : > { %937 = vmatmul.mubr.msk.f32.vlgmr.msra.gmra.mrb[0].mxu1 %vm343_vm0, %v326_v10  ;;  %979 = vmatmul.mubr.msk.f32.vlgmr.msra.gmra.mrb[0].mxu0 %vm343_vm0, %v326_v10  ;;  %v1044_v28 = vpack.c.bf16 %v340_v27, %v339_v26  ;;  %v1048_v31 = vpack.c.bf16 %v342_v30, %v341_v29  ;;  %vm655_vm5 = vmxor %vm653_vm1, %vm1403_vm4  ;;  %s1405_s10 = smov [#allocation11]  }
  0x9c   : > { %1023 = vmatpush3.bf16.msra.mxu1 %v1020_v11  ;;  %1059 = vmatpush3.bf16.msra.mxu0 %v1020_v11  ;;  %vm654_vm7 = vmxor %vm652_vm2, %vm1403_vm4  ;;  %p1287_p6 = pnand %p1286_p1, %p1811_p13  ;;  %s1289_s28 = sshll.u32 %s1405_s10, 4  ;;  %s1290_s28 = int_to_ptr.vmem [resolvable:$false] %s1289_s28 }
  0x9d   : > { %1025 = vmatprep.subr.bf16.mxu1 %v1024_v13  ;;  %1061 = vmatprep.subr.bf16.mxu0 %v1024_v13  ;;  %vm657_vm9 = vmand %vm651_vm3, %vm655_vm5  ;;  %s1291_s0 = scalar_lea.vmem %s1290_s28, 32  ;;  %p1292_p4 = scmp.lt.s32.totalorder %s725_s16, %s1290_s28 }
  0x9e   : > { %vm661_vm11 = vmand %vm657_vm9, %vm659_vm6  ;;  %p1288_p10 = pneg %p1287_p6  ;;  %p1293_p5 = scmp.lt.s32.totalorder %s1291_s0, %s1285_s15 }
  0x9f   : > { %vm665_vm13 = vmxor %vm663_vm8, %vm1403_vm4 }
  0xa0   : > { %1027 = vmatpush3.bf16.msra.mxu1 %v1024_v13  ;;  %1063 = vmatpush3.bf16.msra.mxu0 %v1024_v13  ;;  %vm667_vm15 = vmand %vm661_vm11, %vm665_vm13  ;;  %p1294_p3 = por %p1293_p5, %p1292_p4 }
  0xa1   : > { %1029 = vmatprep.subr.bf16.mxu1 %v1028_v16  ;;  %1065 = vmatprep.subr.bf16.mxu0 %v1028_v16  ;;  %vm656_vm0 = vmand %vm650_vm10, %vm654_vm7  ;;  %v881_v37 = vsel %vm667_vm15, 1.0, %v1404_v36 }
  0xa2   : > { %vm660_vm1 = vmand %vm656_vm0, %vm658_vm12  ;;  %p1295_p7 = pnand %p1294_p3, %p1288_p10 }
  0xa3   : > { %vm664_vm2 = vmxor %vm662_vm14, %vm1403_vm4 }
  0xa4   : > { %1031 = vmatpush3.bf16.msra.mxu1 %v1028_v16  ;;  %1067 = vmatpush3.bf16.msra.mxu0 %v1028_v16  ;;  %vm666_vm3 = vmand %vm660_vm1, %vm664_vm2 }
  0xa5   : > { %1033 = vmatprep.subr.bf16.mxu1 %v1032_v19  ;;  %1069 = vmatprep.subr.bf16.mxu0 %v1032_v19  ;;  %v880_v38 = vsel %vm666_vm3, 1.0, %v1404_v36 }
  0xa6   : > { %v686_v39 = vadd.f32 %v881_v37, %v880_v38 }
  0xa8   : > { %1035 = vmatpush3.bf16.msra.mxu1 %v1032_v19  ;;  %1071 = vmatpush3.bf16.msra.mxu0 %v1032_v19  ;;  %v687_v40 = vrot.slane %v686_v39, 4 }
  0xa9   : > { %1037 = vmatprep.subr.bf16.mxu1 %v1036_v22  ;;  %1073 = vmatprep.subr.bf16.mxu0 %v1036_v22 }
  0xaa   : > { %v688_v41 = vadd.f32 %v687_v40, %v686_v39 }
  0xac   : > { %1039 = vmatpush3.bf16.msra.mxu1 %v1036_v22  ;;  %1075 = vmatpush3.bf16.msra.mxu0 %v1036_v22  ;;  %v689_v42 = vrot.slane %v688_v41, 2 }
  0xad   : > { %1041 = vmatprep.subr.bf16.mxu1 %v1040_v25  ;;  %1077 = vmatprep.subr.bf16.mxu0 %v1040_v25 }
  0xae   : > { %v690_v43 = vadd.f32 %v689_v42, %v688_v41 }
  0xb0   : > { %1043 = vmatpush3.bf16.msra.mxu1 %v1040_v25  ;;  %1079 = vmatpush3.bf16.msra.mxu0 %v1040_v25  ;;  %v691_v44 = vrot.slane %v690_v43, 1 }
  0xb1   : > { %1045 = vmatprep.subr.bf16.mxu1 %v1044_v28  ;;  %1081 = vmatprep.subr.bf16.mxu0 %v1044_v28 }
  0xb2   : > { %v692_v45 = vadd.f32 %v691_v44, %v690_v43 }
  0xb4   : > { %1047 = vmatpush3.bf16.msra.mxu1 %v1044_v28  ;;  %1083 = vmatpush3.bf16.msra.mxu0 %v1044_v28  ;;  %693 = vst [vmem:[%s320_s9] sm:$0x1] %v692_v45 }
  0xb5   : > { %1049 = vmatprep.subr.bf16.mxu1 %v1048_v31  ;;  %1085 = vmatprep.subr.bf16.mxu0 %v1048_v31 }
  0xb8   : > { %1051 = vmatpush3.bf16.msra.mxu1 %v1048_v31  ;;  %1087 = vmatpush3.bf16.msra.mxu0 %v1048_v31 }
 0x16e   : > { %v938_v32 = vpop.f32.mrb[0].mxu1  ;;  %v980_v33 = vpop.f32.mrb[0].mxu0 }
 0x16f   : > { %v416_v34 = vpop.f32.mrb[1].mxu1  ;;  %v566_v35 = vpop.f32.mrb[1].mxu0 }
 0x170   : > { %971 = vmatprep.mubr.f32.mxu1 %v416_v34  ;;  %1013 = vmatprep.mubr.f32.mxu0 %v566_v35 }
 0x171   : > { %972 = vmatmul.mubr.f32.vlgmr.msra.gmra.mrb[2].mxu1 %v938_v32  ;;  %1014 = vmatmul.mubr.f32.vlgmr.msra.gmra.mrb[2].mxu0 %v980_v33 }
 0x172   : > { %1298 = shalt.err (!%p1295_p7)
}
 0x173   : > { %s1299_s6 = scalar_lea.hbm %s1710_s14, 16  ;;  %s1303_s12 = scalar_lea.hbm %s1785_s5, 32 }
 0x174   : > { %p1300_p9 = scmp.ne.s32.totalorder %s1710_s14, %s1299_s6  ;;  %p1304_p11 = scmp.lt.u32.totalorder %s1710_s14, %s1785_s5 }
 0x175   : > { %p1305_p2 = scmp.lt.u32.totalorder %s1303_s12, %s1299_s6  ;;  %p1307_p1 = scmp.lt.u32.totalorder %s1299_s6, %s1710_s14 }
 0x176   : > { %p1301_p0 = pnand %p1300_p9, %p1811_p13 }
 0x177   : > { %p1306_p12 = por %p1305_p2, %p1304_p11 }
 0x178   : > { %p1302_p8 = pneg %p1301_p0 }
 0x179   : > { %p1308_p6 = por %p1307_p1, %p1306_p12 }
 0x17b   : > { %p1309_p10 = pnand %p1308_p6, %p1302_p8 }
 0x17d   : > { %1312 = shalt.err (!%p1309_p10)
}
 0x17e   : > { %1101 = dma.vmem_to_hbm [thread:$0]  (%p1811_p13), %s725_s16, 16, %s1710_s14, %s699_s7  }
 0x17f   : > { %s314_s9 = scalar_lea.vmem [#allocation10], %s1658_s13  ;;  %s1736_s16 = scalar_lea.hbm %s1784_s4, %s882_s24 }
 0x180   : > { %s711_s8 = sshll.u32 %s314_s9, 4  ;;  %s695_s7 = scalar_lea.sflag [#allocation4], %s1658_s13  ;;  %s1738_s8 = int_to_ptr.vmem [resolvable:$true] %s711_s8 }
 0x181   : > { %s1313_s15 = scalar_lea.vmem %s1738_s8, 16  ;;  %s1406_s10 = smov [#allocation10]  }
 0x182   : > { %p1314_p4 = scmp.ne.s32.totalorder %s1738_s8, %s1313_s15  ;;  %s1317_s28 = sshll.u32 %s1406_s10, 4  ;;  %s1318_s28 = int_to_ptr.vmem [resolvable:$false] %s1317_s28 }
 0x183   : > { %s1319_s22 = scalar_lea.vmem %s1318_s28, 32  ;;  %p1320_p7 = scmp.lt.s32.totalorder %s1738_s8, %s1318_s28 }
 0x184   : > { %p1315_p5 = pnand %p1314_p4, %p1811_p13  ;;  %p1321_p9 = scmp.lt.s32.totalorder %s1319_s22, %s1313_s15 }
 0x186   : > { %p1316_p3 = pneg %p1315_p5  ;;  %p1322_p0 = por %p1321_p9, %p1320_p7 }
 0x188   : > { %p1323_p8 = pnand %p1322_p0, %p1316_p3 }
 0x244   : > { %v973_v46 = vpop.f32.mrb[2].mxu1  ;;  %v1015_v47 = vpop.f32.mrb[2].mxu0 }
 0x245   : > { %v491_v48 = vpop.f32.mrb[3].mxu1  ;;  %v673_v49 = vsub.f32 %v973_v46, %v1015_v47  ;;  %v641_v50 = vpop.f32.mrb[3].mxu0 }
 0x246   : > { %v672_v51 = vsub.f32 %v491_v48, %v641_v50 }
 0x247   : > { %v675_v52 = vmul.f32 %v673_v49, %v673_v49 }
 0x248   : > { %v674_v53 = vmul.f32 %v672_v51, %v672_v51 }
 0x249   : > { %v677_v54 = vmul.f32 %v881_v37, %v675_v52 }
 0x24a   : > { %v676_v55 = vmul.f32 %v880_v38, %v674_v53 }
 0x24c   : > { %v678_v56 = vadd.f32 %v677_v54, %v676_v55 }
 0x24e   : > { %v679_v57 = vrot.slane %v678_v56, 4 }
 0x250   : > { %v680_v58 = vadd.f32 %v679_v57, %v678_v56 }
 0x252   : > { %v681_v59 = vrot.slane %v680_v58, 2 }
 0x254   : > { %v682_v60 = vadd.f32 %v681_v59, %v680_v58 }
 0x256   : > { %v683_v61 = vrot.slane %v682_v60, 1 }
 0x258   : > { %v684_v62 = vadd.f32 %v683_v61, %v682_v60 }
 0x25a   : > { %685 = vst [vmem:[%s314_s9] sm:$0x1] %v684_v62 }
 0x25b   : > { %1326 = shalt.err (!%p1323_p8)
}
 0x25c   : > { %s1327_s13 = scalar_lea.hbm %s1736_s16, 16  ;;  %s1331_s6 = scalar_lea.hbm %s1784_s4, 32 }
 0x25d   : > { %p1328_p11 = scmp.ne.s32.totalorder %s1736_s16, %s1327_s13  ;;  %p1332_p1 = scmp.lt.u32.totalorder %s1736_s16, %s1784_s4 }
 0x25e   : > { %p1333_p6 = scmp.lt.u32.totalorder %s1331_s6, %s1327_s13  ;;  %p1335_p4 = scmp.lt.u32.totalorder %s1327_s13, %s1736_s16 }
 0x25f   : > { %p1329_p2 = pnand %p1328_p11, %p1811_p13 }
 0x260   : > { %p1334_p10 = por %p1333_p6, %p1332_p1 }
 0x261   : > { %p1330_p12 = pneg %p1329_p2 }
 0x262   : > { %p1336_p5 = por %p1335_p4, %p1334_p10 }
 0x264   : > { %p1337_p3 = pnand %p1336_p5, %p1330_p12 }
 0x266   : > { %1340 = shalt.err (!%p1337_p3)
}
 0x267   : > { %1100 = dma.vmem_to_hbm [thread:$0]  (%p1811_p13), %s1738_s8, 16, %s1736_s16, %s695_s7  }
 0x268 PF: > { %s736_s12 = sand.u32 1, %s1383_s18   ;;  %p1812_p7 = scmp.ne.s32.totalorder %s1796_s25, 0 }
 0x269   : > { %p1813_p9 = scmp.ge.s32.totalorder %s1395_s21, 2  ;;  %s737_s17 = scalar_lea.sflag [#allocation4], %s736_s12 }
 0x26b   : > { %p1119_p0 = pnand %p1813_p9, %p1812_p7 }
 0x26d   : > { %1374 = dma.done.wait (!%p1119_p0), %s737_s17, 16  }
 0x26e   : > { %1376 = vsyncadd (!%p1119_p0), %s737_s17, 4294967280  ;;  %s745_s26 = scalar_lea.sflag [#allocation12], %s736_s12 }
 0x26f   : > { %1378 = dma.done.wait (!%p1119_p0), %s745_s26, 16  }
 0x270   : > { %1380 = vsyncadd (!%p1119_p0), %s745_s26, 4294967280  ;;  %p26_p13 = scmp.ge.s32.totalorder %s1553_s29, 4   ;;  %s1814_s18 = smov %s1387_s19 }
 0x271   : > { %s1815_s19 = smov %s1391_s20  ;;  %s1816_s20 = smov %s1569_s27 }
 0x272   : > { %s1817_s21 = smov %s1553_s29  ;;  %28 = sbr.rel (!%p26_p13) target bundleno = 13 (0xd), region = 119 }
 0x279   :  { %749 = vsyncpa [#allocation3], 1 }
 0x27a   :  { %751 = vsyncpa [#allocation3 + $0x1], 1 }
 0x27b   :  { %752 = vsyncpa [#allocation6], 1 }
 0x27c   :  { %754 = vsyncpa [#allocation6 + $0x1], 1 }
 0x27d   :  { %755 = vsyncpa [#allocation9], 1 }
 0x27e   :  { %756 = vsyncpa [#allocation4], 1 }
 0x27f   :  { %758 = vsyncpa [#allocation4 + $0x1], 1 }
 0x280   :  { %759 = vsyncpa [#allocation12], 1 }
 0x281   :  { %761 = vsyncpa [#allocation12 + $0x1], 1 }

</bundles_post_ra>
